<compile_context>
chip_gen: v7x
topology: tpu7x:2x2x1
jax: 0.10.0
libtpu: 0.0.40
codegen_flags: <defaults>
</compile_context>

<pallas_src>
import numpy as np
import jax
import jax.numpy as jnp
from jax.experimental import pallas as pl
from jax.experimental.pallas import tpu as pltpu


def _posenc_kernel(freq_ref, phase_ref, usey_ref, posx_ref, posy_ref, out_ref):
    """One (C, L) lane-dense tile of the 2D sinusoidal positional encoding.

    freq_ref, phase_ref, usey_ref : VMEM (C, 1) per-output-channel parameters
    posx_ref, posy_ref            : VMEM (1, L) flattened positions (x = l // Y, y = l % Y)
    out_ref                       : VMEM (C, L) output tile
    """
    posx = posx_ref[...]                  # (1, L)
    posy = posy_ref[...]                  # (1, L)
    usey = usey_ref[...]                  # (C, 1), exactly 0.0 or 1.0
    # Arithmetic blend (exact since usey in {0,1}); pure VPU mul/add broadcasts.
    pos = posx + usey * (posy - posx)                   # (C, L)
    arg = pos * freq_ref[...] + phase_ref[...]          # (C, L); phase is 0 or pi/2
    out_ref[...] = jnp.sin(arg).astype(out_ref.dtype)   # cos(x) == sin(x + pi/2)


def positional_encoding_permute_2d(tensor):
    """JAX/Pallas equivalent of PositionalEncodingPermute2D.forward.

    tensor: (B, C, X, Y) NCHW. Only shape/dtype matter (the torch module ignores values).
    returns: (B, C, X, Y) positional encoding in tensor.dtype.
    """
    B, orig_ch, X, Y = tensor.shape
    channels = int(np.ceil(orig_ch / 4) * 2)            # == PositionalEncoding2D.channels
    half = channels // 2
    inv_freq = (
        1.0 / 10000.0 ** (np.arange(0, channels, 2, dtype=np.float32) / channels)
    ).astype(np.float32)

    # Per-output-channel parameters (output channel c == emb[..., c] of the torch code):
    #   [0, half)                  -> sin(pos_x * f[c])
    #   [half, channels)           -> cos(pos_x * f[c - half])
    #   [channels, channels+half)  -> sin(pos_y * f[c - channels])
    #   [channels+half, 2*channels)-> cos(pos_y * f[c - channels - half])
    c = np.arange(orig_ch)
    use_y = c >= channels
    cc = np.where(use_y, c - channels, c)
    use_cos = cc >= half
    fidx = np.where(use_cos, cc - half, cc)
    freq = inv_freq[fidx].astype(np.float32).reshape(orig_ch, 1)
    phase = (use_cos.astype(np.float32) * np.float32(np.pi / 2)).reshape(orig_ch, 1)
    usey = use_y.astype(np.float32).reshape(orig_ch, 1)

    # Flattened spatial positions for flat index l = x*Y + y.
    XY = X * Y
    posx = np.repeat(np.arange(X, dtype=np.float32), Y).reshape(1, XY)
    posy = np.tile(np.arange(Y, dtype=np.float32), X).reshape(1, XY)

    # Lane-tile size: keep the (double-buffered) output block within a generation-aware
    # VMEM budget. Larger blocks on v5e/v6e (128 MiB VMEM), smaller on v7x (64 MiB).
    itemsize = int(np.dtype(tensor.dtype).itemsize)
    try:
        phys_vmem = int(pltpu.get_tpu_info().vmem_capacity_bytes)
    except Exception:  # conservative fallback (v7x per-core VMEM)
        phys_vmem = 64 * 1024 * 1024
    vmem_limit = int(min(phys_vmem // 2, 64 * 1024 * 1024))
    block_budget = vmem_limit // 4                      # bytes per output buffer

    if XY % 128 == 0 and orig_ch * XY * itemsize > block_budget:
        m = XY // 128
        target_d = max(1, block_budget // (orig_ch * itemsize * 128))
        d = 1
        for cand in range(1, m + 1):
            if cand > target_d:
                break
            if m % cand == 0:
                d = cand
        lane_tile = 128 * d                             # multiple of 128, divides XY
    else:
        # Whole flattened spatial extent in one block (always legal: full dim).
        lane_tile = XY
    num_tiles = XY // lane_tile

    enc = pl.pallas_call(
        _posenc_kernel,
        out_shape=jax.ShapeDtypeStruct((orig_ch, XY), tensor.dtype),
        grid=(num_tiles,),
        in_specs=[
            pl.BlockSpec((orig_ch, 1), lambda j: (0, 0)),    # freq
            pl.BlockSpec((orig_ch, 1), lambda j: (0, 0)),    # phase
            pl.BlockSpec((orig_ch, 1), lambda j: (0, 0)),    # use_y selector
            pl.BlockSpec((1, lane_tile), lambda j: (0, j)),  # flattened pos_x
            pl.BlockSpec((1, lane_tile), lambda j: (0, j)),  # flattened pos_y
        ],
        out_specs=pl.BlockSpec((orig_ch, lane_tile), lambda j: (0, j)),
        compiler_params=pltpu.CompilerParams(
            dimension_semantics=("parallel",),   # v7x megacore; harmless on v5e/v6e
            vmem_limit_bytes=vmem_limit,
        ),
    )(
        jnp.asarray(freq), jnp.asarray(phase), jnp.asarray(usey),
        jnp.asarray(posx), jnp.asarray(posy),
    )

    # Batch-invariant: replicate outside the kernel (torch does .repeat over batch).
    return jnp.broadcast_to(enc.reshape(1, orig_ch, X, Y), (B, orig_ch, X, Y))


def _reference_numpy(tensor):
    """Pure-numpy port of the PyTorch module (the given spec) for verification."""
    B, orig_ch, X, Y = tensor.shape
    channels = int(np.ceil(orig_ch / 4) * 2)
    inv_freq = 1.0 / 10000.0 ** (np.arange(0, channels, 2).astype(np.float32) / channels)
    pos_x = np.arange(X, dtype=np.float32)
    pos_y = np.arange(Y, dtype=np.float32)
    sx = np.einsum("i,j->ij", pos_x, inv_freq)
    sy = np.einsum("i,j->ij", pos_y, inv_freq)
    emb_x = np.concatenate([np.sin(sx), np.cos(sx)], axis=-1)[:, None, :]  # (X,1,CH)
    emb_y = np.concatenate([np.sin(sy), np.cos(sy)], axis=-1)              # (Y,CH)
    emb = np.zeros((X, Y, 2 * channels), dtype=np.float32)
    emb[:, :, :channels] = emb_x
    emb[:, :, channels:2 * channels] = emb_y
    enc = np.broadcast_to(emb[None, :, :, :orig_ch], (B, X, Y, orig_ch))
    return np.transpose(enc, (0, 3, 1, 2)).astype(tensor.dtype)


if __name__ == "__main__":
    key = jax.random.PRNGKey(0)
    x = jax.random.normal(key, (2, 4, 16, 16), dtype=jnp.float32)  # (B, C, X, Y)

    out = positional_encoding_permute_2d(x)
    out = jax.block_until_ready(out)

    ref = _reference_numpy(np.asarray(x))
    np.testing.assert_allclose(np.asarray(out), ref, rtol=1e-5, atol=2e-5)

    print("KERNEL_OK")
</pallas_src>

<mosaic_0001>
module attributes {stable_mosaic.version = 11 : i64} {
  func.func @_posenc_kernel(%arg0: i32, %arg1: memref<4x1xf32, #tpu.memory_space<vmem>>, %arg2: memref<4x1xf32, #tpu.memory_space<vmem>>, %arg3: memref<4x1xf32, #tpu.memory_space<vmem>>, %arg4: memref<1x256xf32, #tpu.memory_space<vmem>>, %arg5: memref<1x256xf32, #tpu.memory_space<vmem>>, %arg6: memref<4x256xf32, #tpu.memory_space<vmem>>) attributes {dimension_semantics = [#tpu.dimension_semantics<parallel>], iteration_bounds = array<i64: 1>, scalar_prefetch = 0 : i64, scratch_operands = 0 : i64, tpu.core_type = #tpu.core_type<tc>, window_params = [{pipeline_mode = #tpu.pipeline_mode<synchronous>, transform_indices = @transform_0, window_bounds = array<i64: 4, 1>}, {pipeline_mode = #tpu.pipeline_mode<synchronous>, transform_indices = @transform_1, window_bounds = array<i64: 4, 1>}, {pipeline_mode = #tpu.pipeline_mode<synchronous>, transform_indices = @transform_2, window_bounds = array<i64: 4, 1>}, {transform_indices = @transform_3, window_bounds = array<i64: 1, 256>}, {transform_indices = @transform_4, window_bounds = array<i64: 1, 256>}, {transform_indices = @transform_5, window_bounds = array<i64: 4, 256>}]} {
    %c0 = arith.constant 0 : index
    %c0_0 = arith.constant 0 : index
    %0 = vector.load %arg4[%c0, %c0_0] : memref<1x256xf32, #tpu.memory_space<vmem>>, vector<1x256xf32>
    %c0_1 = arith.constant 0 : index
    %c0_2 = arith.constant 0 : index
    %1 = vector.load %arg5[%c0_1, %c0_2] : memref<1x256xf32, #tpu.memory_space<vmem>>, vector<1x256xf32>
    %c0_3 = arith.constant 0 : index
    %c0_4 = arith.constant 0 : index
    %2 = vector.load %arg3[%c0_3, %c0_4] : memref<4x1xf32, #tpu.memory_space<vmem>>, vector<4x1xf32>
    %3 = arith.subf %1, %0 : vector<1x256xf32>
    %4 = vector.broadcast %2 : vector<4x1xf32> to vector<4x256xf32>
    %5 = vector.broadcast %3 : vector<1x256xf32> to vector<4x256xf32>
    %6 = arith.mulf %4, %5 : vector<4x256xf32>
    %7 = vector.broadcast %0 : vector<1x256xf32> to vector<4x256xf32>
    %8 = arith.addf %7, %6 : vector<4x256xf32>
    %c0_5 = arith.constant 0 : index
    %c0_6 = arith.constant 0 : index
    %9 = vector.load %arg1[%c0_5, %c0_6] : memref<4x1xf32, #tpu.memory_space<vmem>>, vector<4x1xf32>
    %10 = vector.broadcast %9 : vector<4x1xf32> to vector<4x256xf32>
    %11 = arith.mulf %8, %10 : vector<4x256xf32>
    %c0_7 = arith.constant 0 : index
    %c0_8 = arith.constant 0 : index
    %12 = vector.load %arg2[%c0_7, %c0_8] : memref<4x1xf32, #tpu.memory_space<vmem>>, vector<4x1xf32>
    %13 = vector.broadcast %12 : vector<4x1xf32> to vector<4x256xf32>
    %14 = arith.addf %11, %13 : vector<4x256xf32>
    %15 = math.sin %14 : vector<4x256xf32>
    %c0_9 = arith.constant 0 : index
    %c0_10 = arith.constant 0 : index
    %16 = vector.load %arg6[%c0_9, %c0_10] : memref<4x256xf32, #tpu.memory_space<vmem>>, vector<4x256xf32>
    tpu.vector_store %arg6[%c0_9, %c0_10], %15 {strides = array<i32>} : memref<4x256xf32, #tpu.memory_space<vmem>>, vector<4x256xf32>,
    return
  }
  func.func @transform_0(%arg0: i32) -> (i32, i32) {
    %c0_i32 = arith.constant 0 : i32
    %c0_i32_0 = arith.constant 0 : i32
    %c0_i32_1 = arith.constant 0 : i32
    return %c0_i32, %c0_i32_0 : i32, i32
  }
  func.func @transform_1(%arg0: i32) -> (i32, i32) {
    %c0_i32 = arith.constant 0 : i32
    %c0_i32_0 = arith.constant 0 : i32
    %c0_i32_1 = arith.constant 0 : i32
    return %c0_i32, %c0_i32_0 : i32, i32
  }
  func.func @transform_2(%arg0: i32) -> (i32, i32) {
    %c0_i32 = arith.constant 0 : i32
    %c0_i32_0 = arith.constant 0 : i32
    %c0_i32_1 = arith.constant 0 : i32
    return %c0_i32, %c0_i32_0 : i32, i32
  }
  func.func @transform_3(%arg0: i32) -> (i32, i32) {
    %c0_i32 = arith.constant 0 : i32
    %c0_i32_0 = arith.constant 0 : i32
    return %c0_i32, %arg0 : i32, i32
  }
  func.func @transform_4(%arg0: i32) -> (i32, i32) {
    %c0_i32 = arith.constant 0 : i32
    %c0_i32_0 = arith.constant 0 : i32
    return %c0_i32, %arg0 : i32, i32
  }
  func.func @transform_5(%arg0: i32) -> (i32, i32) {
    %c0_i32 = arith.constant 0 : i32
    %c0_i32_0 = arith.constant 0 : i32
    return %c0_i32, %arg0 : i32, i32
  }
}

</mosaic_0001>

<bundles_post_ra>
// kernel: tpu_custom_call.1
= control target key start
LH: loop header
LB: loop body
LE: loop exit
PB: predicated region body
PF: predicated region fallthrough
CT: control target
= control target key end

     0   :  { %v357_v1 = vmov 0   ;;  %s492_s0 = inlined_call_operand.vmem [shape: f32[4,1], index: 0, kind: input, shape index: {}]   ;;  %s493_s1 = inlined_call_operand.vmem [shape: f32[4,1], index: 1, kind: input, shape index: {}]   ;;  %s494_s2 = inlined_call_operand.vmem [shape: f32[4,1], index: 2, kind: input, shape index: {}]   ;;  %s495_s3 = inlined_call_operand.vmem [shape: f32[1,256], index: 3, kind: input, shape index: {}]   ;;  %s496_s4 = inlined_call_operand.vmem [shape: f32[1,256], index: 4, kind: input, shape index: {}]   ;;  %s497_s5 = inlined_call_operand.hbm [shape: f32[4,256], index: 5, kind: output, shape index: {}]  }
   0x1   :  { %v23_v0 = vld [vmem:[%s494_s2] sm:$0xf]  ;;  %323 = vset.pattern.permute.xlu0 %v357_v1  ;;  %324 = vset.pattern.permute.xlu1 %v357_v1 }
   0x2   :  { %v64_v2 = vld [vmem:[%s493_s1] sm:$0xf]  ;;  %27 = vperm.xlu0 %323, %v23_v0  }
   0x3   :  { %67 = vperm.xlu1 %324, %v64_v2  }
   0x4   :  { %10 = vsyncpa [#allocation3], 0  ;;  %v56_v3 = vld [vmem:[%s492_s0] sm:$0xf]  ;;  %v31_v4 = vlaneseq  ;;  %v358_v46 = vmov 683565275  }
   0x5   :  { %v21_v6 = vld [vmem:[%s495_s3] sm:$0x3]  ;;  %v359_v50 = vmov 2475754826   ;;  %v360_v52 = vmov 2131351028  }
   0x6   :  { %59 = vperm.xlu0 %323, %v56_v3   ;;  %v32_v5 = vshrl.u32 %v31_v4, 7  ;;  %v22_v7 = vld [vmem:[%s496_s4] sm:$0x3]  ;;  %v361_v54 = vmov 2102212464   ;;  %s364_s0 = smov [#allocation2]  }
   0x7   :  { %v24_v10 = vsub.f32 %v22_v7, %v21_v6  ;;  %v362_v56 = vmov 920167782   ;;  %v363_v63 = vmov 1326507024   ;;  %s291_s1 = sshll.u32 %s364_s0, 4  ;;  %s292_s1 = int_to_ptr.vmem [resolvable:$true] %s291_s1 }
   0x8   :  { %v33_v8 = vsub.s32 0, %v32_v5  ;;  %v37_v9 = vsub.s32 1, %v32_v5  ;;  %s333_s3 = scalar_lea.vmem %s292_s1, 128  ;;  %p338_p1 = scmp.lt.s32.totalorder %s292_s1, %s292_s1 }
   0x9   :  { %p334_p0 = scmp.ne.s32.totalorder %s292_s1, %s333_s3  ;;  %p339_p2 = scmp.lt.s32.totalorder %s333_s3, %s333_s3 }
   0xa   :  { %v34_v11 = vrot.slane %v24_v10, %v33_v8  ;;  %v38_v12 = vrot.slane %v24_v10, %v37_v9  ;;  %v47_v13 = vrot.slane %v21_v6, %v33_v8  ;;  %v51_v14 = vrot.slane %v21_v6, %v37_v9 }
   0xb   :  { %p340_p3 = por %p339_p2, %p338_p1 }
   0xd   :  { %p341_p4 = pnand %p340_p3, %p334_p0 }
  0x81   :  { %v28_v15 = vpop.permute.xlu0 %27 }
  0x82   :  { %v41_v16 = vmul.f32 %v34_v11, %v28_v15  ;;  %v42_v17 = vmul.f32 %v38_v12, %v28_v15  ;;  %v68_v21 = vpop.permute.xlu1 %67 }
  0x84   :  { %v54_v18 = vadd.f32 %v47_v13, %v41_v16  ;;  %v55_v19 = vadd.f32 %v51_v14, %v42_v17 }
  0x85   :  { %v60_v20 = vpop.permute.xlu0 %59 }
  0x86   :  { %v62_v22 = vmul.f32 %v60_v20, %v54_v18  ;;  %v63_v23 = vmul.f32 %v60_v20, %v55_v19 }
  0x88   :  { %v410_v24 = vadd.f32 %v68_v21, %v62_v22  ;;  %v412_v25 = vadd.f32 %v68_v21, %v63_v23 }
  0x8a   :  { %v72_v26 = vand.u32 2147483647, %v410_v24  ;;  %v75_v27 = vand.u32 2139095040, %v410_v24  ;;  %v179_v28 = vand.u32 2139095040, %v412_v25  ;;  %v176_v31 = vand.u32 2147483647, %v412_v25 }
  0x8b   :  { %vm74_vm14 = vcmp.lt.s32.totalorder %v410_v24, 0 }
  0x8c   :  { %v76_v29 = vshrl.u32 %v75_v27, 23  ;;  %v79_v30 = vand.u32 8388607, %v72_v26  ;;  %v180_v32 = vshrl.u32 %v179_v28, 23  ;;  %v422_v37 = vand.u32 8388607, %v176_v31 }
  0x8d   :  { %vm465_vm15 = vcmp.le.f32.partialorder %v72_v26, 0.7853982 }
  0x8e   :  { %v299_v33 = vadd.s32 4294967169, %v76_v29  ;;  %v303_v34 = vadd.s32 4294967169, %v180_v32  ;;  %v80_v36 = vor.u32 8388608, %v79_v30  ;;  %v184_v44 = vor.u32 8388608, %v422_v37 }
  0x90   :  { %v82_v35 = vadd.s32 1, %v299_v33  ;;  %v186_v38 = vadd.s32 1, %v303_v34  ;;  %v424_v43 = vshll.u32 %v80_v36, 8 }
  0x92   :  { %vm83_vm0 = vcmp.gt.s32.totalorder %v82_v35, 0  ;;  %vm187_vm1 = vcmp.gt.s32.totalorder %v186_v38, 0 }
  0x93   :  { %v84_v39 = vsel %vm83_vm0, %v82_v35, 0  ;;  %v188_v42 = vsel %vm187_vm1, %v186_v38, 0  ;;  %v224_v38 = vshll.u32 %v184_v44, 8  ;;  %vm178_vm0 = vcmp.lt.s32.totalorder %v412_v25, 0 }
  0x94   :  { %v85_v40 = vshrl.u32 %v84_v39, 5  ;;  %v86_v41 = vand.u32 31, %v84_v39  ;;  %v427_v48 = vshrl.u32 %v188_v42, 5  ;;  %v190_v49 = vand.u32 31, %v188_v42 }
  0x95   :  { %vm177_vm1 = vcmp.le.f32.partialorder %v176_v31, 0.7853982 }
  0x96   :  { %v87_v45 = vsub.s32 32, %v86_v41  ;;  %v89_v47 = vshll.u32 %v358_v46, %v86_v41  ;;  %v92_v51 = vshll.u32 %v359_v50, %v86_v41  ;;  %v95_v53 = vshll.u32 %v360_v52, %v86_v41 }
  0x97   :  { %v98_v55 = vshll.u32 %v361_v54, %v86_v41  ;;  %v101_v57 = vshll.u32 %v362_v56, %v86_v41  ;;  %vm104_vm2 = vcmp.lt.s32.totalorder %v85_v40, 1  ;;  %vm105_vm3 = vcmp.lt.s32.totalorder %v85_v40, 2 }
  0x98   :  { %v90_v58 = vshrl.u32 %v359_v50, %v87_v45  ;;  %v93_v59 = vshrl.u32 %v360_v52, %v87_v45  ;;  %v96_v60 = vshrl.u32 %v361_v54, %v87_v45  ;;  %v88_v61 = vshrl.u32 %v358_v46, %v87_v45 }
  0x99   :  { %v99_v62 = vshrl.u32 %v362_v56, %v87_v45  ;;  %v102_v0 = vshrl.u32 %v363_v63, %v87_v45  ;;  %v191_v4 = vsub.s32 32, %v190_v49  ;;  %vm106_vm4 = vcmp.lt.s32.totalorder %v85_v40, 3 }
  0x9a   :  { %v91_v1 = vor.u32 %v90_v58, %v89_v47  ;;  %v94_v2 = vor.u32 %v93_v59, %v92_v51  ;;  %v97_v3 = vor.u32 %v96_v60, %v95_v53  ;;  %vm107_vm5 = vcmp.lt.s32.totalorder %v85_v40, 4 }
  0x9b   :  { %v100_v5 = vor.u32 %v99_v62, %v98_v55  ;;  %v103_v6 = vor.u32 %v102_v0, %v101_v57  ;;  %v193_v14 = vshll.u32 %v358_v46, %v190_v49  ;;  %v194_v17 = vshrl.u32 %v359_v50, %v191_v4 }
  0x9c   :  { %v108_v7 = vsel %vm104_vm2, %v88_v61, %v91_v1  ;;  %v109_v8 = vsel %vm107_vm5, %v97_v3, 2102212464  ;;  %v112_v9 = vsel %vm104_vm2, %v91_v1, %v94_v2  ;;  %v116_v10 = vsel %vm104_vm2, %v94_v2, %v97_v3 }
  0x9d   :  { %v110_v11 = vsel %vm106_vm4, %v94_v2, %v109_v8  ;;  %v113_v12 = vsel %vm107_vm5, %v100_v5, 920167782  ;;  %v117_v13 = vsel %vm107_vm5, %v103_v6, 1326507024  ;;  %v196_v18 = vshll.u32 %v359_v50, %v190_v49 }
  0x9e   :  { %v114_v15 = vsel %vm106_vm4, %v97_v3, %v113_v12  ;;  %v118_v16 = vsel %vm106_vm4, %v100_v5, %v117_v13  ;;  %v111_v19 = vsel %vm105_vm3, %v108_v7, %v110_v11  ;;  %v197_v22 = vshrl.u32 %v360_v52, %v191_v4 }
  0x9f   :  { %v115_v20 = vsel %vm105_vm3, %v112_v9, %v114_v15  ;;  %v119_v21 = vsel %vm105_vm3, %v116_v10, %v118_v16  ;;  %v195_v30 = vor.u32 %v194_v17, %v193_v14  ;;  %v199_v33 = vshll.u32 %v360_v52, %v190_v49 }
  0xa0   :  { %v436_v23 = vmul.u32.u64.low %v424_v43, %v119_v21  ;;  %v437_v27 = vmul.u32.u64.high %v424_v43, %v119_v21, %v436_v23  ;;  %v440_v28 = vmul.u32.u64.low %v424_v43, %v115_v20  ;;  %v441_v29 = vmul.u32.u64.high %v424_v43, %v115_v20, %v440_v28 }
  0xa1   :  { %v198_v32 = vor.u32 %v197_v22, %v196_v18  ;;  %v200_v34 = vshrl.u32 %v361_v54, %v191_v4  ;;  %v202_v35 = vshll.u32 %v361_v54, %v190_v49  ;;  %v203_v36 = vshrl.u32 %v362_v56, %v191_v4 }
  0xa2   :  { %v206_v37 = vshrl.u32 %v363_v63, %v191_v4  ;;  %v127_v39 = vmul.u32 %v424_v43, %v111_v19  ;;  %v192_v40 = vshrl.u32 %v358_v46, %v191_v4  ;;  %v205_v42 = vshll.u32 %v362_v56, %v190_v49 }
  0xa3   :  { %v201_v41 = vor.u32 %v200_v34, %v199_v33  ;;  %vm129_vm6 = vc.u32 %v437_v27, %v440_v28  ;;  %v130_v45 = vadd.s32 1, %v441_v29  ;;  %v204_v47 = vor.u32 %v203_v36, %v202_v35 }
  0xa4   :  { %vm208_vm7 = vcmp.lt.s32.totalorder %v427_v48, 1  ;;  %v207_v50 = vor.u32 %v206_v37, %v205_v42  ;;  %vm210_vm8 = vcmp.lt.s32.totalorder %v427_v48, 3  ;;  %vm211_vm9 = vcmp.lt.s32.totalorder %v427_v48, 4 }
  0xa5   :  { %v216_v51 = vsel %vm208_vm7, %v195_v30, %v198_v32  ;;  %v131_v44 = vsel %vm129_vm6, %v130_v45, %v441_v29  ;;  %v213_v52 = vsel %vm211_vm9, %v201_v41, 2102212464  ;;  %v217_v43 = vsel %vm211_vm9, %v204_v47, 920167782 }
  0xa6   :  { %v220_v46 = vsel %vm208_vm7, %v198_v32, %v201_v41  ;;  %v132_v53 = vadd.s32 %v131_v44, %v127_v39  ;;  %vm209_vm10 = vcmp.lt.s32.totalorder %v427_v48, 2  ;;  %v218_v49 = vsel %vm210_vm8, %v201_v41, %v217_v43 }
  0xa7   :  { %v221_v54 = vsel %vm211_vm9, %v207_v50, 1326507024  ;;  %v212_v55 = vsel %vm208_vm7, %v192_v40, %v195_v30  ;;  %v214_v56 = vsel %vm210_vm8, %v198_v32, %v213_v52  ;;  %v219_v57 = vsel %vm209_vm10, %v216_v51, %v218_v49 }
  0xa8   :  { %v222_v58 = vsel %vm210_vm8, %v204_v47, %v221_v54  ;;  %v133_v59 = vadd.s32 536870912, %v132_v53  ;;  %v451_v61 = vmul.u32.u64.low %v224_v38, %v219_v57  ;;  %v452_v62 = vmul.u32.u64.high %v224_v38, %v219_v57, %v451_v61 }
  0xa9   :  { %v223_v60 = vsel %vm209_vm10, %v220_v46, %v222_v58  ;;  %v215_v2 = vsel %vm209_vm10, %v212_v55, %v214_v56  ;;  %v128_v18 = vadd.s32 %v440_v28, %v437_v27  ;;  %vm164_vm6 = vweird.f32 %v410_v24 }
  0xaa   :  { %v454_v63 = vmul.u32.u64.low %v224_v38, %v223_v60  ;;  %v455_v0 = vmul.u32.u64.high %v224_v38, %v223_v60, %v454_v63  ;;  %v134_v1 = vshrl.u32 %v133_v59, 30  ;;  %v234_v4 = vadd.s32 1, %v452_v62 }
  0xab   :  { %v231_v48 = vmul.u32 %v224_v38, %v215_v2  ;;  %vm268_vm9 = vweird.f32 %v412_v25 }
  0xac   :  { %v135_v3 = vshll.u32 %v134_v1, 30  ;;  %vm233_vm11 = vc.u32 %v455_v0, %v451_v61  ;;  %v232_v39 = vadd.s32 %v451_v61, %v455_v0  ;;  %v158_v43 = vsub.s32 4, %v134_v1 }
  0xad   :  { %v235_v6 = vsel %vm233_vm11, %v234_v4, %v452_v62 }
  0xae   :  { %v136_v5 = vsub.s32 %v132_v53, %v135_v3  ;;  %v236_v7 = vadd.s32 %v235_v6, %v231_v48  ;;  %v159_v55 = vsel %vm74_vm14, %v158_v43, %v134_v1 }
  0xaf   :  { %v161_v26 = vsel %vm465_vm15, 0, %v159_v55 }
  0xb0   :  { %v138_v8 = vsub.s32 0, %v136_v5  ;;  %v237_v9 = vadd.s32 536870912, %v236_v7  ;;  %v165_v61 = vadd.s32 3, %v161_v26 }
  0xb2   :  { %v300_v10 = vmin.u32 %v138_v8, %v136_v5  ;;  %v238_v11 = vshrl.u32 %v237_v9, 30  ;;  %v166_v2 = vand.u32 3, %v165_v61 }
  0xb4   :  { %v140_v12 = vclz %v300_v10  ;;  %v239_v13 = vshll.u32 %v238_v11, 30  ;;  %v262_v57 = vsub.s32 4, %v238_v11  ;;  %vm168_vm2 = vcmp.eq.s32.totalorder %v166_v2, 0 }
  0xb5   :  { %vm171_vm3 = vcmp.eq.s32.totalorder %v166_v2, 2  ;;  %vm167_vm4 = vcmp.lt.s32.totalorder %v166_v2, 2 }
  0xb6   :  { %v301_v14 = vadd.s32 4294967294, %v140_v12  ;;  %v240_v15 = vsub.s32 %v236_v7, %v239_v13  ;;  %v263_v60 = vsel %vm178_vm0, %v262_v57, %v238_v11 }
  0xb7   :  { %v265_v0 = vsel %vm177_vm1, 0, %v263_v60 }
  0xb8   :  { %vm302_vm12 = vcmp.lt.s32.totalorder %v301_v14, 0  ;;  %v242_v17 = vsub.s32 0, %v240_v15  ;;  %v269_v48 = vadd.s32 3, %v265_v0 }
  0xb9   :  { %v143_v16 = vsel %vm302_vm12, 0, %v301_v14 }
  0xba   :  { %v144_v19 = vsub.s32 32, %v143_v16  ;;  %v148_v20 = vsub.s32 4294967266, %v143_v16  ;;  %v304_v21 = vmin.u32 %v242_v17, %v240_v15  ;;  %v145_v22 = vshll.u32 %v136_v5, %v143_v16 }
  0xbb   :  { %v270_v7 = vand.u32 3, %v269_v48 }
  0xbc   :  { %v146_v23 = vshrl.u32 %v128_v18, %v144_v19  ;;  %v149_v29 = vadd.s32 127, %v148_v20  ;;  %v244_v30 = vclz %v304_v21 }
  0xbd   :  { %vm275_vm5 = vcmp.eq.s32.totalorder %v270_v7, 2  ;;  %vm272_vm7 = vcmp.eq.s32.totalorder %v270_v7, 0  ;;  %vm271_vm8 = vcmp.lt.s32.totalorder %v270_v7, 2 }
  0xbe   :  { %v147_v32 = vor.u32 %v146_v23, %v145_v22  ;;  %v150_v33 = vshll.u32 %v149_v29, 23  ;;  %v305_v34 = vadd.s32 4294967294, %v244_v30 }
  0xc0   :  { %v151_v35 = vor.u32 4788187, %v150_v33  ;;  %vm306_vm13 = vcmp.lt.s32.totalorder %v305_v34, 0  ;;  %v154_v37 = vcvt.s32.f32 %v147_v32 }
  0xc1   :  { %v247_v38 = vsel %vm306_vm13, 0, %v305_v34 }
  0xc2   :  { %v152_v36 = vand.u32 2147483647, %v151_v35  ;;  %v248_v40 = vsub.s32 32, %v247_v38  ;;  %v252_v41 = vsub.s32 4294967266, %v247_v38  ;;  %v249_v28 = vshll.u32 %v240_v15, %v247_v38 }
  0xc4   :  { %v155_v27 = vmul.f32 %v154_v37, %v152_v36  ;;  %v250_v42 = vshrl.u32 %v232_v39, %v248_v40  ;;  %v253_v45 = vadd.s32 127, %v252_v41 }
  0xc6   :  { %v156_v47 = vxor.u32 2147483648, %v155_v27  ;;  %v251_v50 = vor.u32 %v250_v42, %v249_v28  ;;  %v254_v51 = vshll.u32 %v253_v45, 23 }
  0xc8   :  { %v157_v44 = vsel %vm74_vm14, %v156_v47, %v155_v27  ;;  %v255_v46 = vor.u32 4788187, %v254_v51  ;;  %v258_v54 = vcvt.s32.f32 %v251_v50 }
  0xc9   :  { %v160_v53 = vsel %vm465_vm15, %v410_v24, %v157_v44 }
  0xca   :  { %325 = vcosq.f32 %v160_v53  ;;  %v256_v49 = vand.u32 2147483647, %v255_v46 }
  0xcb   :  { %327 = vsinq.f32 %v160_v53 }
  0xcc   :  { %v259_v56 = vmul.f32 %v258_v54, %v256_v49 }
  0xce   :  { %v260_v58 = vxor.u32 2147483648, %v259_v56 }
  0xd0   :  { %v261_v59 = vsel %vm178_vm0, %v260_v58, %v259_v56 }
  0xd1   :  { %v264_v62 = vsel %vm177_vm1, %v412_v25, %v261_v59 }
  0xd2   :  { %329 = vcosq.f32 %v264_v62 }
  0xd3   :  { %331 = vsinq.f32 %v264_v62 }
  0xd4   :  { %v326_v63 = vpop.eup %325 }
  0xd5   :  { %v328_v1 = vpop.eup %327  ;;  %v172_v4 = vxor.u32 2147483648, %v326_v63 }
  0xd6   :  { %v169_v3 = vxor.u32 2147483648, %v328_v1 }
  0xd7   :  { %v173_v6 = vsel %vm171_vm3, %v172_v4, %v328_v1 }
  0xd8   :  { %v170_v5 = vsel %vm168_vm2, %v326_v63, %v169_v3 }
  0xd9   :  { %v174_v9 = vsel %vm167_vm4, %v170_v5, %v173_v6 }
  0xda   :  { %v175_v13 = vsel %vm164_vm6, nan, %v174_v9 }
  0xdc   :  { %v330_v8 = vpop.eup %329 }
  0xdd   :  { %v332_v31 = vpop.eup %331  ;;  %v276_v10 = vxor.u32 2147483648, %v330_v8 }
  0xde   :  { %v273_v11 = vxor.u32 2147483648, %v332_v31 }
  0xdf   :  { %v277_v12 = vsel %vm275_vm5, %v276_v10, %v332_v31 }
  0xe0   :  { %v274_v14 = vsel %vm272_vm7, %v330_v8, %v273_v11 }
  0xe1   :  { %v278_v15 = vsel %vm271_vm8, %v274_v14, %v277_v12 }
  0xe2   :  { %v279_v16 = vsel %vm268_vm9, nan, %v278_v15 }
  0xe3   :  { %v282_v17 = vcombine.low %v175_v13, %v279_v16 }
  0xe5   :  { %284 = vst [vmem:[#allocation2] sm:$0xff] %v282_v17 }
  0xe6   :  { %344 = shalt.err (!%p341_p4)
}
  0xe7   :  { %s345_s28 = scalar_lea.hbm %s497_s5, 128 }
  0xe8   :  { %p346_p5 = scmp.ne.s32.totalorder %s497_s5, %s345_s28  ;;  %p349_p6 = scmp.lt.u32.totalorder %s345_s28, %s497_s5 }
  0xea   :  { %p351_p7 = pnand %p349_p6, %p346_p5 }
  0xec   :  { %354 = shalt.err (!%p351_p7)
}
  0xed   :  { %294 = dma.vmem_to_hbm [thread:$0]  %s292_s1, 128, %s497_s5, [#allocation3]  }
  0xee   :  { %355 = dma.done.wait [#allocation3], 128  }
  0xef   :  { %356 = vsyncadd [#allocation3], 4294967168 }
  0xf0   :  { %298 = vsyncpa [#allocation3], 1 }

</bundles_post_ra>
